<compile_context>
chip_gen: v5e
topology: v5e:2x2
jax: 0.10.0
libtpu: 0.0.40
codegen_flags: <defaults>
</compile_context>

<pallas_src>
import jax
import jax.numpy as jnp
from jax import lax
from jax.experimental import pallas as pl
from jax.experimental.pallas import tpu as pltpu

EPS = 1e-12          # torch.nn.functional.normalize default eps
EPS_SQ = EPS * EPS   # clamp on sum-of-squares == clamping the norm at EPS


def _netvlad_kernel(x_ref, w_ref, cent_ref, bias_ref, out_ref):
    # x_ref   : (B, C, P) channel-major descriptors for B images (P = H*W)
    # w_ref   : (K, C)    conv weight = 2*alpha*centroids
    # cent_ref: (K, C)    raw centroids
    # bias_ref: (K, 1)    conv bias = -alpha*||centroid_k||
    # out_ref : (B, K, C) fully normalized VLAD descriptors
    B = x_ref.shape[0]
    w = w_ref[...]                                   # (K, C)
    cent = cent_ref[...]                             # (K, C)
    bias = bias_ref[...]                             # (K, 1)

    for b in range(B):                               # B small & static -> unrolled
        x = x_ref[b]                                 # (C, P), free leading-dim slice

        # 1) per-pixel L2 normalization along C:  x / max(||x||, eps)
        sumsq = jnp.sum(x * x, axis=0, keepdims=True)            # (1, P)
        xn = x * lax.rsqrt(jnp.maximum(sumsq, EPS_SQ))           # (C, P)

        # 2) 1x1 conv: MXU in its native layout (contract C = rhs sublane dim)
        logits = jnp.dot(w, xn,
                         preferred_element_type=jnp.float32) + bias   # (K, P)

        # 3) softmax over the K clusters (leading axis)
        m = jnp.max(logits, axis=0, keepdims=True)               # (1, P)
        e = jnp.exp(logits - m)                                  # (K, P)
        soft = e * (1.0 / jnp.sum(e, axis=0, keepdims=True))     # (K, P)

        # 4) aggregation: vlad = soft @ xn^T - (sum_p soft) * centroids
        agg = lax.dot_general(soft, xn, (((1,), (1,)), ((), ())),
                              preferred_element_type=jnp.float32)     # (K, C)
        s_sum = jnp.sum(soft, axis=1, keepdims=True)             # (K, 1) lane reduce
        vlad = agg - s_sum * cent                                # (K, C)

        # 5a) intra-normalization (L2 over C per cluster)
        vs = jnp.sum(vlad * vlad, axis=1, keepdims=True)         # (K, 1)
        vlad = vlad * lax.rsqrt(jnp.maximum(vs, EPS_SQ))

        # 5b) global L2 normalization over the flattened (K*C) descriptor
        g = jnp.sum(vlad * vlad)
        vlad = vlad * lax.rsqrt(jnp.maximum(g, EPS_SQ))

        out_ref[b] = vlad


def _pick_batch_block(n, c, p, max_b=8, block_budget_bytes=6 << 20):
    """Largest divisor of n (<= max_b) whose x block fits the VMEM budget."""
    best = 1
    for b in range(1, min(n, max_b) + 1):
        if n % b == 0 and b * c * p * 4 <= block_budget_bytes:
            best = b
    return best


def netvlad_pallas(x_nchw, centroids, alpha=100.0, batch_block=None):
    """x_nchw: (N, C, H, W) float32; centroids: (K, C) float32 -> (N, K*C)."""
    N, C, H, W = x_nchw.shape
    K = centroids.shape[0]
    P = H * W

    cent = centroids.astype(jnp.float32)
    # Hoisted conv params (grid-invariant).
    w = (2.0 * float(alpha)) * cent                                           # (K, C)
    bias = (-float(alpha) * jnp.sqrt(jnp.sum(cent * cent, axis=1)))[:, None]  # (K, 1)

    # Channel-major layout kept: only a free (contiguous) reshape, matching
    # torch's x.view(N, C, -1).  No HBM transpose pass.
    x_p = x_nchw.reshape(N, C, P).astype(jnp.float32)

    B = batch_block if batch_block is not None else _pick_batch_block(N, C, P)
    assert N % B == 0, "batch block must divide N"

    out = pl.pallas_call(
        _netvlad_kernel,
        out_shape=jax.ShapeDtypeStruct((N, K, C), jnp.float32),
        grid_spec=pltpu.PrefetchScalarGridSpec(
            num_scalar_prefetch=0,
            grid=(N // B,),
            in_specs=[
                pl.BlockSpec((B, C, P), lambda n: (n, 0, 0)),   # x block (B images)
                pl.BlockSpec((K, C), lambda n: (0, 0)),         # conv weight (shared)
                pl.BlockSpec((K, C), lambda n: (0, 0)),         # centroids (shared)
                pl.BlockSpec((K, 1), lambda n: (0, 0)),         # bias (shared)
            ],
            out_specs=pl.BlockSpec((B, K, C), lambda n: (n, 0, 0)),
        ),
        compiler_params=pltpu.CompilerParams(
            dimension_semantics=("parallel",)),
    )(x_p, w, cent, bias)

    return out.reshape(N, K * C)


def netvlad_reference(x_nchw, centroids, alpha=100.0):
    """Pure-JAX reference mirroring the PyTorch forward exactly."""
    N, C, H, W = x_nchw.shape
    K = centroids.shape[0]
    nrm = jnp.sqrt(jnp.sum(x_nchw * x_nchw, axis=1, keepdims=True))
    x = x_nchw / jnp.maximum(nrm, EPS)
    w = 2.0 * alpha * centroids                                    # (K, C)
    b = -alpha * jnp.sqrt(jnp.sum(centroids * centroids, axis=1))  # (K,)
    logits = jnp.einsum("nchw,kc->nkhw", x, w) + b[None, :, None, None]
    logits = logits.reshape(N, K, -1)
    soft = jax.nn.softmax(logits, axis=1)                          # (N, K, P)
    xf = x.reshape(N, C, -1)                                       # (N, C, P)
    residual = xf[:, None, :, :] - centroids[None, :, :, None]     # (N, K, C, P)
    residual = residual * soft[:, :, None, :]
    vlad = residual.sum(-1)                                        # (N, K, C)
    vlad = vlad / jnp.maximum(
        jnp.sqrt(jnp.sum(vlad * vlad, axis=2, keepdims=True)), EPS)
    vlad = vlad.reshape(N, -1)
    vlad = vlad / jnp.maximum(
        jnp.sqrt(jnp.sum(vlad * vlad, axis=1, keepdims=True)), EPS)
    return vlad


if __name__ == "__main__":
    # Small shapes consistent with the module (dim=C, num_clusters=K).
    N, C, H, W = 2, 128, 8, 8
    K = 16
    alpha = 100.0

    key = jax.random.PRNGKey(0)
    kx, kc = jax.random.split(key)
    x = jax.random.normal(kx, (N, C, H, W), dtype=jnp.float32)
    # centroids ~ torch.rand -> uniform [0, 1)
    centroids = jax.random.uniform(kc, (K, C), dtype=jnp.float32)

    out = netvlad_pallas(x, centroids, alpha=alpha)
    out = jax.block_until_ready(out)

    ref = netvlad_reference(x, centroids, alpha=alpha)
    assert out.shape == (N, K * C)
    assert jnp.allclose(out, ref, atol=5e-5, rtol=5e-5), (
        float(jnp.max(jnp.abs(out - ref))))

    print("KERNEL_OK")
</pallas_src>

<mosaic_0001>
module attributes {stable_mosaic.version = 11 : i64} {
  func.func @_netvlad_kernel(%arg0: i32, %arg1: memref<2x128x64xf32, #tpu.memory_space<vmem>>, %arg2: memref<16x128xf32, #tpu.memory_space<vmem>>, %arg3: memref<16x128xf32, #tpu.memory_space<vmem>>, %arg4: memref<16x1xf32, #tpu.memory_space<vmem>>, %arg5: memref<2x16x128xf32, #tpu.memory_space<vmem>>) attributes {dimension_semantics = [#tpu.dimension_semantics<parallel>], iteration_bounds = array<i64: 1>, scalar_prefetch = 0 : i64, scratch_operands = 0 : i64, tpu.core_type = #tpu.core_type<tc>, window_params = [{transform_indices = @transform_0, window_bounds = array<i64: 2, 128, 64>}, {pipeline_mode = #tpu.pipeline_mode<synchronous>, transform_indices = @transform_1, window_bounds = array<i64: 16, 128>}, {pipeline_mode = #tpu.pipeline_mode<synchronous>, transform_indices = @transform_2, window_bounds = array<i64: 16, 128>}, {pipeline_mode = #tpu.pipeline_mode<synchronous>, transform_indices = @transform_3, window_bounds = array<i64: 16, 1>}, {transform_indices = @transform_4, window_bounds = array<i64: 2, 16, 128>}]} {
    %c0 = arith.constant 0 : index
    %c0_0 = arith.constant 0 : index
    %0 = vector.load %arg2[%c0, %c0_0] : memref<16x128xf32, #tpu.memory_space<vmem>>, vector<16x128xf32>
    %c0_1 = arith.constant 0 : index
    %c0_2 = arith.constant 0 : index
    %1 = vector.load %arg3[%c0_1, %c0_2] : memref<16x128xf32, #tpu.memory_space<vmem>>, vector<16x128xf32>
    %c0_3 = arith.constant 0 : index
    %c0_4 = arith.constant 0 : index
    %2 = vector.load %arg4[%c0_3, %c0_4] : memref<16x1xf32, #tpu.memory_space<vmem>>, vector<16x1xf32>
    %c0_5 = arith.constant 0 : index
    %c0_6 = arith.constant 0 : index
    %c0_7 = arith.constant 0 : index
    %3 = vector.load %arg1[%c0_5, %c0_6, %c0_7] : memref<2x128x64xf32, #tpu.memory_space<vmem>>, vector<1x128x64xf32>
    %4 = vector.shape_cast %3 : vector<1x128x64xf32> to vector<128x64xf32>
    %5 = arith.mulf %4, %4 : vector<128x64xf32>
    %cst = arith.constant dense<0.000000e+00> : vector<64xf32>
    %6 = vector.multi_reduction <add>, %5, %cst [0] : vector<128x64xf32> to vector<64xf32>
    %7 = vector.shape_cast %6 : vector<64xf32> to vector<1x64xf32>
    %cst_8 = arith.constant 1.000000e-24 : f32
    %8 = vector.broadcast %cst_8 : f32 to vector<1x64xf32>
    %9 = arith.maximumf %7, %8 : vector<1x64xf32>
    %10 = math.rsqrt %9 : vector<1x64xf32>
    %11 = vector.broadcast %10 : vector<1x64xf32> to vector<128x64xf32>
    %12 = arith.mulf %4, %11 : vector<128x64xf32>
    %cst_9 = arith.constant dense<0.000000e+00> : vector<16x64xf32>
    %13 = tpu.matmul %0, %12, %cst_9 {dimension_numbers = #tpu.dot_dimension_numbers<[1], [0], [0], [1], [0, 0, 1, 1], [], []>} : vector<16x128xf32>, vector<128x64xf32>, vector<16x64xf32> -> vector<16x64xf32>
    %14 = vector.broadcast %2 : vector<16x1xf32> to vector<16x64xf32>
    %15 = arith.addf %13, %14 : vector<16x64xf32>
    %cst_10 = arith.constant dense<0xFF800000> : vector<64xf32>
    %16 = vector.multi_reduction <maximumf>, %15, %cst_10 [0] : vector<16x64xf32> to vector<64xf32>
    %17 = vector.shape_cast %16 : vector<64xf32> to vector<1x64xf32>
    %18 = vector.broadcast %17 : vector<1x64xf32> to vector<16x64xf32>
    %19 = arith.subf %15, %18 : vector<16x64xf32>
    %20 = math.exp %19 : vector<16x64xf32>
    %cst_11 = arith.constant dense<0.000000e+00> : vector<64xf32>
    %21 = vector.multi_reduction <add>, %20, %cst_11 [0] : vector<16x64xf32> to vector<64xf32>
    %22 = vector.shape_cast %21 : vector<64xf32> to vector<1x64xf32>
    %cst_12 = arith.constant 1.000000e+00 : f32
    %23 = vector.broadcast %cst_12 : f32 to vector<1x64xf32>
    %24 = arith.divf %23, %22 : vector<1x64xf32>
    %25 = vector.broadcast %24 : vector<1x64xf32> to vector<16x64xf32>
    %26 = arith.mulf %20, %25 : vector<16x64xf32>
    %cst_13 = arith.constant dense<0.000000e+00> : vector<16x128xf32>
    %27 = tpu.matmul %26, %12, %cst_13 {dimension_numbers = #tpu.dot_dimension_numbers<[1], [1], [0], [0], [0, 0, 1, 0], [], []>} : vector<16x64xf32>, vector<128x64xf32>, vector<16x128xf32> -> vector<16x128xf32>
    %cst_14 = arith.constant dense<0.000000e+00> : vector<16xf32>
    %28 = vector.multi_reduction <add>, %26, %cst_14 [1] : vector<16x64xf32> to vector<16xf32>
    %29 = vector.shape_cast %28 : vector<16xf32> to vector<16x1xf32>
    %30 = vector.broadcast %29 : vector<16x1xf32> to vector<16x128xf32>
    %31 = arith.mulf %30, %1 : vector<16x128xf32>
    %32 = arith.subf %27, %31 : vector<16x128xf32>
    %33 = arith.mulf %32, %32 : vector<16x128xf32>
    %cst_15 = arith.constant dense<0.000000e+00> : vector<16xf32>
    %34 = vector.multi_reduction <add>, %33, %cst_15 [1] : vector<16x128xf32> to vector<16xf32>
    %35 = vector.shape_cast %34 : vector<16xf32> to vector<16x1xf32>
    %cst_16 = arith.constant 1.000000e-24 : f32
    %36 = vector.broadcast %cst_16 : f32 to vector<16x1xf32>
    %37 = arith.maximumf %35, %36 : vector<16x1xf32>
    %38 = math.rsqrt %37 : vector<16x1xf32>
    %39 = vector.broadcast %38 : vector<16x1xf32> to vector<16x128xf32>
    %40 = arith.mulf %32, %39 : vector<16x128xf32>
    %41 = arith.mulf %40, %40 : vector<16x128xf32>
    %42 = vector.shape_cast %41 : vector<16x128xf32> to vector<1x16x128xf32>
    %cst_17 = arith.constant dense<0.000000e+00> : vector<1xf32>
    %43 = vector.multi_reduction <add>, %42, %cst_17 [1, 2] : vector<1x16x128xf32> to vector<1xf32>
    %44 = vector.shape_cast %43 : vector<1xf32> to vector<1x1x1xf32>
    %45 = vector.extract %44[0, 0, 0] : f32 from vector<1x1x1xf32>
    %cst_18 = arith.constant 1.000000e-24 : f32
    %46 = arith.maximumf %45, %cst_18 : f32
    %47 = math.rsqrt %46 : f32
    %48 = vector.broadcast %47 : f32 to vector<16x128xf32>
    %49 = arith.mulf %40, %48 : vector<16x128xf32>
    %c0_19 = arith.constant 0 : index
    %c0_20 = arith.constant 0 : index
    %c0_21 = arith.constant 0 : index
    %50 = vector.load %arg5[%c0_19, %c0_20, %c0_21] : memref<2x16x128xf32, #tpu.memory_space<vmem>>, vector<1x16x128xf32>
    %51 = vector.shape_cast %50 : vector<1x16x128xf32> to vector<16x128xf32>
    %52 = vector.shape_cast %49 : vector<16x128xf32> to vector<1x16x128xf32>
    tpu.vector_store %arg5[%c0_19, %c0_20, %c0_21], %52 {strides = array<i32>} : memref<2x16x128xf32, #tpu.memory_space<vmem>>, vector<1x16x128xf32>,
    %c1 = arith.constant 1 : index
    %c0_22 = arith.constant 0 : index
    %c0_23 = arith.constant 0 : index
    %53 = vector.load %arg1[%c1, %c0_22, %c0_23] : memref<2x128x64xf32, #tpu.memory_space<vmem>>, vector<1x128x64xf32>
    %54 = vector.shape_cast %53 : vector<1x128x64xf32> to vector<128x64xf32>
    %55 = arith.mulf %54, %54 : vector<128x64xf32>
    %cst_24 = arith.constant dense<0.000000e+00> : vector<64xf32>
    %56 = vector.multi_reduction <add>, %55, %cst_24 [0] : vector<128x64xf32> to vector<64xf32>
    %57 = vector.shape_cast %56 : vector<64xf32> to vector<1x64xf32>
    %cst_25 = arith.constant 1.000000e-24 : f32
    %58 = vector.broadcast %cst_25 : f32 to vector<1x64xf32>
    %59 = arith.maximumf %57, %58 : vector<1x64xf32>
    %60 = math.rsqrt %59 : vector<1x64xf32>
    %61 = vector.broadcast %60 : vector<1x64xf32> to vector<128x64xf32>
    %62 = arith.mulf %54, %61 : vector<128x64xf32>
    %cst_26 = arith.constant dense<0.000000e+00> : vector<16x64xf32>
    %63 = tpu.matmul %0, %62, %cst_26 {dimension_numbers = #tpu.dot_dimension_numbers<[1], [0], [0], [1], [0, 0, 1, 1], [], []>} : vector<16x128xf32>, vector<128x64xf32>, vector<16x64xf32> -> vector<16x64xf32>
    %64 = vector.broadcast %2 : vector<16x1xf32> to vector<16x64xf32>
    %65 = arith.addf %63, %64 : vector<16x64xf32>
    %cst_27 = arith.constant dense<0xFF800000> : vector<64xf32>
    %66 = vector.multi_reduction <maximumf>, %65, %cst_27 [0] : vector<16x64xf32> to vector<64xf32>
    %67 = vector.shape_cast %66 : vector<64xf32> to vector<1x64xf32>
    %68 = vector.broadcast %67 : vector<1x64xf32> to vector<16x64xf32>
    %69 = arith.subf %65, %68 : vector<16x64xf32>
    %70 = math.exp %69 : vector<16x64xf32>
    %cst_28 = arith.constant dense<0.000000e+00> : vector<64xf32>
    %71 = vector.multi_reduction <add>, %70, %cst_28 [0] : vector<16x64xf32> to vector<64xf32>
    %72 = vector.shape_cast %71 : vector<64xf32> to vector<1x64xf32>
    %cst_29 = arith.constant 1.000000e+00 : f32
    %73 = vector.broadcast %cst_29 : f32 to vector<1x64xf32>
    %74 = arith.divf %73, %72 : vector<1x64xf32>
    %75 = vector.broadcast %74 : vector<1x64xf32> to vector<16x64xf32>
    %76 = arith.mulf %70, %75 : vector<16x64xf32>
    %cst_30 = arith.constant dense<0.000000e+00> : vector<16x128xf32>
    %77 = tpu.matmul %76, %62, %cst_30 {dimension_numbers = #tpu.dot_dimension_numbers<[1], [1], [0], [0], [0, 0, 1, 0], [], []>} : vector<16x64xf32>, vector<128x64xf32>, vector<16x128xf32> -> vector<16x128xf32>
    %cst_31 = arith.constant dense<0.000000e+00> : vector<16xf32>
    %78 = vector.multi_reduction <add>, %76, %cst_31 [1] : vector<16x64xf32> to vector<16xf32>
    %79 = vector.shape_cast %78 : vector<16xf32> to vector<16x1xf32>
    %80 = vector.broadcast %79 : vector<16x1xf32> to vector<16x128xf32>
    %81 = arith.mulf %80, %1 : vector<16x128xf32>
    %82 = arith.subf %77, %81 : vector<16x128xf32>
    %83 = arith.mulf %82, %82 : vector<16x128xf32>
    %cst_32 = arith.constant dense<0.000000e+00> : vector<16xf32>
    %84 = vector.multi_reduction <add>, %83, %cst_32 [1] : vector<16x128xf32> to vector<16xf32>
    %85 = vector.shape_cast %84 : vector<16xf32> to vector<16x1xf32>
    %cst_33 = arith.constant 1.000000e-24 : f32
    %86 = vector.broadcast %cst_33 : f32 to vector<16x1xf32>
    %87 = arith.maximumf %85, %86 : vector<16x1xf32>
    %88 = math.rsqrt %87 : vector<16x1xf32>
    %89 = vector.broadcast %88 : vector<16x1xf32> to vector<16x128xf32>
    %90 = arith.mulf %82, %89 : vector<16x128xf32>
    %91 = arith.mulf %90, %90 : vector<16x128xf32>
    %92 = vector.shape_cast %91 : vector<16x128xf32> to vector<1x16x128xf32>
    %cst_34 = arith.constant dense<0.000000e+00> : vector<1xf32>
    %93 = vector.multi_reduction <add>, %92, %cst_34 [1, 2] : vector<1x16x128xf32> to vector<1xf32>
    %94 = vector.shape_cast %93 : vector<1xf32> to vector<1x1x1xf32>
    %95 = vector.extract %94[0, 0, 0] : f32 from vector<1x1x1xf32>
    %cst_35 = arith.constant 1.000000e-24 : f32
    %96 = arith.maximumf %95, %cst_35 : f32
    %97 = math.rsqrt %96 : f32
    %98 = vector.broadcast %97 : f32 to vector<16x128xf32>
    %99 = arith.mulf %90, %98 : vector<16x128xf32>
    %c1_36 = arith.constant 1 : index
    %c0_37 = arith.constant 0 : index
    %c0_38 = arith.constant 0 : index
    %100 = vector.load %arg5[%c1_36, %c0_37, %c0_38] : memref<2x16x128xf32, #tpu.memory_space<vmem>>, vector<1x16x128xf32>
    %101 = vector.shape_cast %100 : vector<1x16x128xf32> to vector<16x128xf32>
    %102 = vector.shape_cast %99 : vector<16x128xf32> to vector<1x16x128xf32>
    tpu.vector_store %arg5[%c1_36, %c0_37, %c0_38], %102 {strides = array<i32>} : memref<2x16x128xf32, #tpu.memory_space<vmem>>, vector<1x16x128xf32>,
    return
  }
  func.func @transform_0(%arg0: i32) -> (i32, i32, i32) {
    %c0_i32 = arith.constant 0 : i32
    %c0_i32_0 = arith.constant 0 : i32
    %c0_i32_1 = arith.constant 0 : i32
    return %arg0, %c0_i32, %c0_i32_0 : i32, i32, i32
  }
  func.func @transform_1(%arg0: i32) -> (i32, i32) {
    %c0_i32 = arith.constant 0 : i32
    %c0_i32_0 = arith.constant 0 : i32
    %c0_i32_1 = arith.constant 0 : i32
    return %c0_i32, %c0_i32_0 : i32, i32
  }
  func.func @transform_2(%arg0: i32) -> (i32, i32) {
    %c0_i32 = arith.constant 0 : i32
    %c0_i32_0 = arith.constant 0 : i32
    %c0_i32_1 = arith.constant 0 : i32
    return %c0_i32, %c0_i32_0 : i32, i32
  }
  func.func @transform_3(%arg0: i32) -> (i32, i32) {
    %c0_i32 = arith.constant 0 : i32
    %c0_i32_0 = arith.constant 0 : i32
    %c0_i32_1 = arith.constant 0 : i32
    return %c0_i32, %c0_i32_0 : i32, i32
  }
  func.func @transform_4(%arg0: i32) -> (i32, i32, i32) {
    %c0_i32 = arith.constant 0 : i32
    %c0_i32_0 = arith.constant 0 : i32
    %c0_i32_1 = arith.constant 0 : i32
    return %arg0, %c0_i32, %c0_i32_0 : i32, i32, i32
  }
}

</mosaic_0001>

<bundles_post_ra>
// kernel: tpu_custom_call.1
= control target key start
LH: loop header
LB: loop body
LE: loop exit
PB: predicated region body
PF: predicated region fallthrough
CT: control target
= control target key end

     0   :  { %vm56_vm0 = vcmask 523264   ;;  %s1229_s0 = inlined_call_operand.vmem [shape: f32[2,128,64], index: 0, kind: input, shape index: {}]   ;;  %s1230_s1 = inlined_call_operand.vmem [shape: f32[16,128], index: 1, kind: input, shape index: {}]   ;;  %s1231_s2 = inlined_call_operand.vmem [shape: f32[16,128], index: 2, kind: input, shape index: {}]   ;;  %s1232_s3 = inlined_call_operand.vmem [shape: f32[16,1], index: 3, kind: input, shape index: {}]   ;;  %s1233_s4 = inlined_call_operand.hbm [shape: f32[2,16,128], index: 4, kind: output, shape index: {}]  }
   0x1   :  { %v822_v0 = vld [vmem:[%s1229_s0] sm:$0xff]  ;;  %v827_v1 = vld [vmem:[%s1229_s0 + $0x8] sm:$0xff]  ;;  %v832_v2 = vld [vmem:[%s1229_s0 + $0x10] sm:$0xff] }
   0x2   :  { %v837_v3 = vld [vmem:[%s1229_s0 + $0x18] sm:$0xff]  ;;  %v842_v4 = vld [vmem:[%s1229_s0 + $0x20] sm:$0xff]  ;;  %v40_v5 = vmul.f32 %v822_v0, %v822_v0  ;;  %v41_v6 = vmul.f32 %v827_v1, %v827_v1  ;;  %v42_v7 = vmul.f32 %v832_v2, %v832_v2  ;;  %v855_v9 = vld [vmem:[%s1229_s0 + $0x28] sm:$0xff] }
   0x3   :  { %v43_v8 = vmul.f32 %v837_v3, %v837_v3  ;;  %v44_v11 = vmul.f32 %v842_v4, %v842_v4  ;;  %v864_v13 = vld [vmem:[%s1229_s0 + $0x30] sm:$0xff]  ;;  %v45_v15 = vmul.f32 %v855_v9, %v855_v9  ;;  %v873_v18 = vld [vmem:[%s1229_s0 + $0x38] sm:$0xff]  ;;  %v878_v20 = vld [vmem:[%s1229_s0 + $0x80] sm:$0xff] }
   0x4   :  { %v57_v10 = vsel %vm56_vm0, %v40_v5, 0.0  ;;  %v58_v12 = vsel %vm56_vm0, %v41_v6, 0.0  ;;  %v60_v16 = vsel %vm56_vm0, %v42_v7, 0.0  ;;  %v46_v21 = vmul.f32 %v864_v13, %v864_v13  ;;  %v886_v23 = vld [vmem:[%s1229_s0 + $0x88] sm:$0xff]  ;;  %v891_v24 = vld [vmem:[%s1229_s0 + $0x90] sm:$0xff]  ;;  %v896_v25 = vld [vmem:[%s1229_s0 + $0x40] sm:$0xff] }
   0x5   :  { %v59_v14 = vadd.f32 %v58_v12, %v57_v10  ;;  %v62_v17 = vsel %vm56_vm0, %v43_v8, 0.0  ;;  %v64_v22 = vsel %vm56_vm0, %v44_v11, 0.0  ;;  %v47_v27 = vmul.f32 %v873_v18, %v873_v18  ;;  %v904_v29 = vld [vmem:[%s1229_s0 + $0x98] sm:$0xff]  ;;  %v911_v31 = vld [vmem:[%s1229_s0 + $0x48] sm:$0xff] }
   0x6   :  { %v66_v28 = vsel %vm56_vm0, %v45_v15, 0.0  ;;  %v359_v30 = vmul.f32 %v878_v20, %v878_v20  ;;  %v360_v33 = vmul.f32 %v886_v23, %v886_v23  ;;  %v361_v34 = vmul.f32 %v891_v24, %v891_v24 }
   0x7   :  { %v61_v19 = vadd.f32 %v60_v16, %v59_v14 }
   0x9   :  { %v63_v26 = vadd.f32 %v62_v17, %v61_v19 }
   0xb   :  { %v65_v32 = vadd.f32 %v64_v22, %v63_v26 }
   0xc   :  { %9 = vsyncpa [#allocation3], 0  ;;  %v48_v35 = vmul.f32 %v896_v25, %v896_v25  ;;  %v68_v36 = vsel %vm56_vm0, %v46_v21, 0.0  ;;  %v923_v37 = vld [vmem:[%s1229_s0 + $0xa0] sm:$0xff]  ;;  %v928_v38 = vld [vmem:[%s1229_s0 + $0x50] sm:$0xff]  ;;  %v362_v40 = vmul.f32 %v904_v29, %v904_v29  ;;  %v49_v41 = vmul.f32 %v911_v31, %v911_v31  ;;  %s791_s15 = smov [#allocation2]  }
   0xd   :  { %v67_v39 = vadd.f32 %v66_v28, %v65_v32  ;;  %v70_v42 = vsel %vm56_vm0, %v47_v27, 0.0  ;;  %v938_v43 = vld [vmem:[%s1229_s0 + $0xa8] sm:$0xff]  ;;  %v375_v44 = vsel %vm56_vm0, %v359_v30, 0.0  ;;  %v944_v45 = vld [vmem:[%s1229_s0 + $0x58] sm:$0xff]  ;;  %v363_v47 = vmul.f32 %v923_v37, %v923_v37  ;;  %v956_v52 = vld [vmem:[%s1229_s0 + $0xb0] sm:$0xff]  ;;  %s655_s16 = sshll.u32 %s791_s15, 4  ;;  %s656_s16 = int_to_ptr.vmem [resolvable:$true] %s655_s16 }
   0xe   :  { %v376_v48 = vsel %vm56_vm0, %v360_v33, 0.0  ;;  %v378_v49 = vsel %vm56_vm0, %v361_v34, 0.0  ;;  %v50_v50 = vmul.f32 %v928_v38, %v928_v38  ;;  %v72_v51 = vsel %vm56_vm0, %v48_v35, 0.0  ;;  %v961_v54 = vld [vmem:[%s1229_s0 + $0x60] sm:$0xff]  ;;  %v972_v60 = vld [vmem:[%s1229_s0 + $0xb8] sm:$0xff]  ;;  %v977_v62 = vld [vmem:[%s1229_s0 + $0x68] sm:$0xff] }
   0xf   :  { %v69_v46 = vadd.f32 %v68_v36, %v67_v39  ;;  %v377_v53 = vadd.f32 %v376_v48, %v375_v44  ;;  %v364_v56 = vmul.f32 %v938_v43, %v938_v43  ;;  %v380_v57 = vsel %vm56_vm0, %v362_v40, 0.0  ;;  %v988_v10 = vld [vmem:[%s1229_s0 + $0xc0] sm:$0xff]  ;;  %v993_v12 = vld [vmem:[%s1229_s0 + $0x70] sm:$0xff]  ;;  %v1004_v21 = vld [vmem:[%s1229_s0 + $0xc8] sm:$0xff]  ;;  %s790_s10 = smov 1e-24  }
  0x10   :  { %v51_v58 = vmul.f32 %v944_v45, %v944_v45  ;;  %v74_v59 = vsel %vm56_vm0, %v49_v41, 0.0  ;;  %v365_v5 = vmul.f32 %v956_v52, %v956_v52  ;;  %v382_v6 = vsel %vm56_vm0, %v363_v47, 0.0  ;;  %v1009_v26 = vld [vmem:[%s1229_s0 + $0x78] sm:$0xff]  ;;  %v1020_v34 = vld [vmem:[%s1229_s0 + $0xd0] sm:$0xff]  ;;  %s657_s19 = sshll.u32 %s1233_s4, 4  ;;  %s792_s21 = smov 128   ;;  %s658_s19 = int_to_ptr.hbm [resolvable:$true] %s657_s19 }
  0x11   :  { %v71_v55 = vadd.f32 %v70_v42, %v69_v46  ;;  %v379_v61 = vadd.f32 %v378_v49, %v377_v53  ;;  %v52_v7 = vmul.f32 %v961_v54, %v961_v54  ;;  %v76_v8 = vsel %vm56_vm0, %v50_v50, 0.0  ;;  %v1031_v44 = vld [vmem:[%s1229_s0 + $0xd8] sm:$0xff]  ;;  %s793_s22 = smov 8  }
  0x12   :  { %v366_v15 = vmul.f32 %v972_v60, %v972_v60  ;;  %v384_v16 = vsel %vm56_vm0, %v364_v56, 0.0  ;;  %v53_v17 = vmul.f32 %v977_v62, %v977_v62  ;;  %v78_v19 = vsel %vm56_vm0, %v51_v58, 0.0 }
  0x13   :  { %v73_v63 = vadd.f32 %v72_v51, %v71_v55  ;;  %v381_v11 = vadd.f32 %v380_v57, %v379_v61  ;;  %v367_v28 = vmul.f32 %v988_v10, %v988_v10  ;;  %v386_v30 = vsel %vm56_vm0, %v365_v5, 0.0  ;;  %v1040_v51 = vld [vmem:[%s1229_s0 + $0xe0] sm:$0xff] }
  0x14   :  { %v54_v32 = vmul.f32 %v993_v12, %v993_v12  ;;  %v80_v33 = vsel %vm56_vm0, %v52_v7, 0.0  ;;  %v368_v39 = vmul.f32 %v1004_v21, %v1004_v21  ;;  %v388_v40 = vsel %vm56_vm0, %v366_v15, 0.0  ;;  %v1057_v7 = vld [vmem:[%s1229_s0 + $0xf0] sm:$0xff] }
  0x15   :  { %v75_v14 = vadd.f32 %v74_v59, %v73_v63  ;;  %v383_v22 = vadd.f32 %v382_v6, %v381_v11  ;;  %v55_v41 = vmul.f32 %v1009_v26, %v1009_v26  ;;  %v82_v42 = vsel %vm56_vm0, %v53_v17, 0.0  ;;  %v1049_v59 = vld [vmem:[%s1229_s0 + $0xe8] sm:$0xff] }
  0x16   :  { %v369_v48 = vmul.f32 %v1020_v34, %v1020_v34  ;;  %v390_v49 = vsel %vm56_vm0, %v367_v28, 0.0  ;;  %v84_v50 = vsel %vm56_vm0, %v54_v32, 0.0  ;;  %v370_v56 = vmul.f32 %v1031_v44, %v1031_v44 }
  0x17   :  { %v77_v27 = vadd.f32 %v76_v8, %v75_v14  ;;  %v385_v35 = vadd.f32 %v384_v16, %v383_v22  ;;  %v392_v57 = vsel %vm56_vm0, %v368_v39, 0.0  ;;  %v86_v58 = vsel %vm56_vm0, %v55_v41, 0.0  ;;  %v1065_v16 = vld [vmem:[%s1229_s0 + $0xf8] sm:$0xff] }
  0x18   :  { %v371_v5 = vmul.f32 %v1040_v51, %v1040_v51  ;;  %v394_v6 = vsel %vm56_vm0, %v369_v48, 0.0  ;;  %v372_v14 = vmul.f32 %v1049_v59, %v1049_v59  ;;  %v396_v15 = vsel %vm56_vm0, %v370_v56, 0.0 }
  0x19   :  { %v79_v36 = vadd.f32 %v78_v19, %v77_v27  ;;  %v387_v46 = vadd.f32 %v386_v30, %v385_v35  ;;  %v373_v22 = vmul.f32 %v1057_v7, %v1057_v7  ;;  %v374_v32 = vmul.f32 %v1065_v16, %v1065_v16 }
  0x1a   :  { %v398_v27 = vsel %vm56_vm0, %v371_v5, 0.0 }
  0x1b   :  { %v81_v47 = vadd.f32 %v80_v33, %v79_v36  ;;  %v389_v53 = vadd.f32 %v388_v40, %v387_v46  ;;  %v400_v33 = vsel %vm56_vm0, %v372_v14, 0.0  ;;  %v402_v39 = vsel %vm56_vm0, %v373_v22, 0.0 }
  0x1d   :  { %v83_v55 = vadd.f32 %v82_v42, %v81_v47  ;;  %v391_v61 = vadd.f32 %v390_v49, %v389_v53  ;;  %v404_v42 = vsel %vm56_vm0, %v374_v32, 0.0 }
  0x1f   :  { %v85_v63 = vadd.f32 %v84_v50, %v83_v55  ;;  %v393_v8 = vadd.f32 %v392_v57, %v391_v61 }
  0x21   :  { %v87_v11 = vadd.f32 %v86_v58, %v85_v63  ;;  %v395_v17 = vadd.f32 %v394_v6, %v393_v8 }
  0x23   :  { %v88_v19 = vrot.slane %v87_v11, 4  ;;  %v397_v28 = vadd.f32 %v396_v15, %v395_v17 }
  0x25   :  { %v89_v30 = vadd.f32 %v88_v19, %v87_v11  ;;  %v399_v35 = vadd.f32 %v398_v27, %v397_v28 }
  0x27   :  { %v90_v36 = vrot.slane %v89_v30, 2  ;;  %v401_v40 = vadd.f32 %v400_v33, %v399_v35 }
  0x29   :  { %v91_v41 = vadd.f32 %v90_v36, %v89_v30  ;;  %v403_v46 = vadd.f32 %v402_v39, %v401_v40 }
  0x2b   :  { %v92_v47 = vrot.slane %v91_v41, 1  ;;  %v405_v48 = vadd.f32 %v404_v42, %v403_v46  ;;  %v789_v42 = vmov 0   ;;  %v23_v46 = vld [vmem:[%s1232_s3 + $0x8] sm:$0xff] }
  0x2c   :  { %734 = vset.pattern.permute.xlu0 %v789_v42 }
  0x2d   :  { %v93_v49 = vadd.f32 %v92_v47, %v91_v41  ;;  %v406_v50 = vrot.slane %v405_v48, 4  ;;  %v19_v47 = vld [vmem:[%s1230_s1 + $0x8] sm:$0xff] }
  0x2f   :  { %v94_v53 = vmax.f32 %v93_v49, 1e-24  ;;  %v407_v55 = vadd.f32 %v406_v50, %v405_v48 }
  0x31   :  { %735 = vrsqrt.f32 %v94_v53  ;;  %v408_v56 = vrot.slane %v407_v55, 2  ;;  %vm101_vm1 = vweird.f32 %v94_v53 }
  0x33   :  { %v409_v57 = vadd.f32 %v408_v56, %v407_v55 }
  0x35   :  { %v410_v58 = vrot.slane %v409_v57, 1 }
  0x37   :  { %v736_v61 = vpop.eup %735  ;;  %v411_v5 = vadd.f32 %v410_v58, %v409_v57 }
  0x38   :  { %v96_v63 = vmul.f32 %v736_v61, %v94_v53  ;;  %vm102_vm2 = vweird.f32 %v736_v61 }
  0x39   :  { %v412_v8 = vmax.f32 %v411_v5, 1e-24  ;;  %vm103_vm3 = vmor %vm101_vm1, %vm102_vm2 }
  0x3a   :  { %v97_v6 = vmul.f32 %v736_v61, %v96_v63 }
  0x3b   :  { %737 = vrsqrt.f32 %v412_v8  ;;  %vm419_vm4 = vweird.f32 %v412_v8 }
  0x3c   :  { %v98_v11 = vmul.f32 0.5, %v97_v6 }
  0x3e   :  { %v99_v14 = vsub.f32 1.5, %v98_v11 }
  0x40   :  { %v100_v15 = vmul.f32 %v736_v61, %v99_v14 }
  0x41   :  { %v738_v17 = vpop.eup %737 }
  0x42   :  { %v1075_v19 = vsel %vm103_vm3, %v736_v61, %v100_v15  ;;  %v414_v27 = vmul.f32 %v738_v17, %v412_v8  ;;  %vm420_vm5 = vweird.f32 %v738_v17 }
  0x43   :  { %v120_v22 = vmul.f32 %v1075_v19, %v1009_v26  ;;  %v119_v28 = vmul.f32 %v1075_v19, %v993_v12  ;;  %v118_v32 = vmul.f32 %v1075_v19, %v977_v62  ;;  %v117_v35 = vmul.f32 %v1075_v19, %v961_v54  ;;  %vm421_vm6 = vmor %vm419_vm4, %vm420_vm5 }
  0x44   :  { %v415_v30 = vmul.f32 %v738_v17, %v414_v27  ;;  %v116_v26 = vmul.f32 %v1075_v19, %v944_v45  ;;  %v115_v62 = vmul.f32 %v1075_v19, %v928_v38  ;;  %v114_v40 = vmul.f32 %v1075_v19, %v911_v31 }
  0x45   :  { %131 = vmatpush.msra.mxu0 %v120_v22  ;;  %669 = vmatpush.xpose.msk.msra.mxu1 %vm56_vm0, %v120_v22  ;;  %v113_v41 = vmul.f32 %v1075_v19, %v896_v25  ;;  %v112_v31 = vmul.f32 %v1075_v19, %v873_v18  ;;  %v111_v25 = vmul.f32 %v1075_v19, %v864_v13 }
  0x46   :  { %v416_v33 = vmul.f32 0.5, %v415_v30  ;;  %v109_v13 = vmul.f32 %v1075_v19, %v842_v4  ;;  %v107_v4 = vmul.f32 %v1075_v19, %v832_v2  ;;  %v105_v2 = vmul.f32 %v1075_v19, %v822_v0 }
  0x47   :  { %132 = vmatpush.msra.mxu0 %v119_v28 }
  0x48   :  { %v417_v36 = vsub.f32 1.5, %v416_v33 }
  0x49   :  { %133 = vmatpush.msra.mxu0 %v118_v32  ;;  %670 = vmatpush.xpose.msk.msra.mxu1 %vm56_vm0, %v119_v28 }
  0x4a   :  { %v418_v12 = vmul.f32 %v738_v17, %v417_v36 }
  0x4b   :  { %134 = vmatpush.msra.mxu0 %v117_v35 }
  0x4c   :  { %v1091_v39 = vsel %vm421_vm6, %v738_v17, %v418_v12 }
  0x4d   :  { %135 = vmatpush.msra.mxu0 %v116_v26  ;;  %v438_v54 = vmul.f32 %v1065_v16, %v1091_v39  ;;  %v437_v45 = vmul.f32 %v1057_v7, %v1091_v39  ;;  %671 = vmatpush.xpose.msk.msra.mxu1 %vm56_vm0, %v118_v32  ;;  %v436_v38 = vmul.f32 %v1049_v59, %v1091_v39  ;;  %v22_v16 = vld [vmem:[%s1232_s3] sm:$0xff] }
  0x4e   :  { %v435_v7 = vmul.f32 %v1040_v51, %v1091_v39  ;;  %v434_v18 = vmul.f32 %v1031_v44, %v1091_v39  ;;  %123 = vperm.xlu0 %734, %v22_v16   ;;  %v110_v59 = vmul.f32 %v1075_v19, %v855_v9  ;;  %v433_v51 = vmul.f32 %v1020_v34, %v1091_v39 }
  0x4f   :  { %136 = vmatpush.msra.mxu0 %v115_v62  ;;  %439 = vmatpush.msra.mxu2 %v438_v54  ;;  %v432_v44 = vmul.f32 %v1004_v21, %v1091_v39  ;;  %v108_v9 = vmul.f32 %v1075_v19, %v837_v3  ;;  %v431_v34 = vmul.f32 %v988_v10, %v1091_v39 }
  0x50   :  { %703 = vmatpush.xpose.msk.msra.mxu3 %vm56_vm0, %v438_v54  ;;  %v430_v3 = vmul.f32 %v972_v60, %v1091_v39  ;;  %v106_v21 = vmul.f32 %v1075_v19, %v827_v1  ;;  %v429_v10 = vmul.f32 %v956_v52, %v1091_v39  ;;  %v428_v60 = vmul.f32 %v938_v43, %v1091_v39  ;;  %v18_v1 = vld [vmem:[%s1230_s1] sm:$0xff] }
  0x51   :  { %137 = vmatpush.msra.mxu0 %v114_v40  ;;  %440 = vmatpush.msra.mxu2 %v437_v45  ;;  %v427_v52 = vmul.f32 %v923_v37, %v1091_v39  ;;  %v426_v0 = vmul.f32 %v904_v29, %v1091_v39  ;;  %v425_v43 = vmul.f32 %v891_v24, %v1091_v39 }
  0x52   :  { %672 = vmatpush.xpose.msk.msra.mxu1 %vm56_vm0, %v117_v35  ;;  %v424_v37 = vmul.f32 %v886_v23, %v1091_v39  ;;  %v423_v29 = vmul.f32 %v878_v20, %v1091_v39 }
  0x53   :  { %138 = vmatpush.msra.mxu0 %v113_v41  ;;  %441 = vmatpush.msra.mxu2 %v436_v38 }
  0x54   :  { %704 = vmatpush.xpose.msk.msra.mxu3 %vm56_vm0, %v437_v45 }
  0x55   :  { %139 = vmatpush.msra.mxu0 %v112_v31  ;;  %442 = vmatpush.msra.mxu2 %v435_v7 }
  0x56   :  { %673 = vmatpush.xpose.msk.msra.mxu1 %vm56_vm0, %v116_v26  ;;  %128 = vperm.xlu0 %734, %v23_v46  }
  0x57   :  { %140 = vmatpush.msra.mxu0 %v111_v25  ;;  %443 = vmatpush.msra.mxu2 %v434_v18 }
  0x58   :  { %705 = vmatpush.xpose.msk.msra.mxu3 %vm56_vm0, %v436_v38 }
  0x59   :  { %141 = vmatpush.msra.mxu0 %v110_v59  ;;  %444 = vmatpush.msra.mxu2 %v433_v51 }
  0x5a   :  { %674 = vmatpush.xpose.msk.msra.mxu1 %vm56_vm0, %v115_v62 }
  0x5b   :  { %142 = vmatpush.msra.mxu0 %v109_v13  ;;  %445 = vmatpush.msra.mxu2 %v432_v44 }
  0x5c   :  { %706 = vmatpush.xpose.msk.msra.mxu3 %vm56_vm0, %v435_v7 }
  0x5d   :  { %143 = vmatpush.msra.mxu0 %v108_v9  ;;  %446 = vmatpush.msra.mxu2 %v431_v34 }
  0x5e   :  { %675 = vmatpush.xpose.msk.msra.mxu1 %vm56_vm0, %v114_v40 }
  0x5f   :  { %144 = vmatpush.msra.mxu0 %v107_v4  ;;  %447 = vmatpush.msra.mxu2 %v430_v3 }
  0x60   :  { %707 = vmatpush.xpose.msk.msra.mxu3 %vm56_vm0, %v434_v18 }
  0x61   :  { %145 = vmatpush.msra.mxu0 %v106_v21  ;;  %448 = vmatpush.msra.mxu2 %v429_v10 }
  0x62   :  { %676 = vmatpush.xpose.msk.msra.mxu1 %vm56_vm0, %v113_v41 }
  0x63   :  { %146 = vmatpush.msra.mxu0 %v105_v2  ;;  %449 = vmatpush.msra.mxu2 %v428_v60 }
  0x64   :  { %147 = vmatmul.f32.vlgmr.msra.gmra.mxu0 %v18_v1  ;;  %708 = vmatpush.xpose.msk.msra.mxu3 %vm56_vm0, %v433_v51 }
  0x65   :  { %450 = vmatpush.msra.mxu2 %v427_v52 }
  0x66   :  { %677 = vmatpush.xpose.msk.msra.mxu1 %vm56_vm0, %v112_v31 }
  0x67   :  { %451 = vmatpush.msra.mxu2 %v426_v0 }
  0x68   :  { %709 = vmatpush.xpose.msk.msra.mxu3 %vm56_vm0, %v432_v44 }
  0x69   :  { %452 = vmatpush.msra.mxu2 %v425_v43 }
  0x6a   :  { %678 = vmatpush.xpose.msk.msra.mxu1 %vm56_vm0, %v111_v25 }
  0x6b   :  { %453 = vmatpush.msra.mxu2 %v424_v37 }
  0x6c   :  { %150 = vmatmul.f32.gmra.mxu0 %v19_v47  ;;  %710 = vmatpush.xpose.msk.msra.mxu3 %vm56_vm0, %v431_v34 }
  0x6d   :  { %454 = vmatpush.msra.mxu2 %v423_v29 }
  0x6e   :  { %455 = vmatmul.f32.vlgmr.msra.gmra.mxu2 %v18_v1  ;;  %679 = vmatpush.xpose.msk.msra.mxu1 %vm56_vm0, %v110_v59 }
  0x70   :  { %711 = vmatpush.xpose.msk.msra.mxu3 %vm56_vm0, %v430_v3 }
  0x72   :  { %680 = vmatpush.xpose.msk.msra.mxu1 %vm56_vm0, %v109_v13 }
  0x74   :  { %712 = vmatpush.xpose.msk.msra.mxu3 %vm56_vm0, %v429_v10 }
  0x76   :  { %458 = vmatmul.f32.gmra.mxu2 %v19_v47  ;;  %681 = vmatpush.xpose.msk.msra.mxu1 %vm56_vm0, %v108_v9 }
  0x78   :  { %713 = vmatpush.xpose.msk.msra.mxu3 %vm56_vm0, %v428_v60 }
  0x7a   :  { %682 = vmatpush.xpose.msk.msra.mxu1 %vm56_vm0, %v107_v4 }
  0x7c   :  { %714 = vmatpush.xpose.msk.msra.mxu3 %vm56_vm0, %v427_v52 }
  0x7e   :  { %683 = vmatpush.xpose.msk.msra.mxu1 %vm56_vm0, %v106_v21 }
  0x80   :  { %715 = vmatpush.xpose.msk.msra.mxu3 %vm56_vm0, %v426_v0 }
  0x82   :  { %684 = vmatpush.xpose.msk.msra.mxu1 %vm56_vm0, %v105_v2 }
  0x84   :  { %716 = vmatpush.xpose.msk.msra.mxu3 %vm56_vm0, %v425_v43 }
  0x88   :  { %717 = vmatpush.xpose.msk.msra.mxu3 %vm56_vm0, %v424_v37 }
  0x8c   :  { %718 = vmatpush.xpose.msk.msra.mxu3 %vm56_vm0, %v423_v29 }
  0xc0   :  { %v124_v20 = vpop.permute.xlu0 %123 }
  0xc8   :  { %v129_v48 = vpop.permute.xlu0 %128 }
  0xe1   :  { %v148_v23 = vpop.f32.mrf.mxu0 }
  0xe2   :  { %v149_v24 = vadd.f32 %v148_v23, %v124_v20 }
  0xe4   :  { %v154_v53 = vsel %vm56_vm0, %v149_v24, -inf }
  0xe9   :  { %v151_v49 = vpop.f32.mrf.mxu0 }
  0xea   :  { %v152_v50 = vadd.f32 %v151_v49, %v129_v48 }
  0xec   :  { %v155_v55 = vsel %vm56_vm0, %v152_v50, -inf }
  0xed   :  { %v156_v56 = vmax.f32 %v154_v53, %v155_v55 }
  0xef   :  { %v157_v57 = vrot.slane %v156_v56, 4 }
  0xf1   :  { %v158_v58 = vmax.f32 %v156_v56, %v157_v57  ;;  %v456_v61 = vpop.f32.mrf.mxu2 }
  0xf2   :  { %v457_v8 = vadd.f32 %v456_v61, %v124_v20 }
  0xf3   :  { %v159_v63 = vrot.slane %v158_v58, 2 }
  0xf4   :  { %v462_v22 = vsel %vm56_vm0, %v457_v8, -inf }
  0xf5   :  { %v160_v5 = vmax.f32 %v158_v58, %v159_v63 }
  0xf7   :  { %v161_v6 = vrot.slane %v160_v5, 1 }
  0xf9   :  { %v162_v11 = vmax.f32 %v160_v5, %v161_v6  ;;  %v459_v14 = vpop.f32.mrf.mxu2 }
  0xfa   :  { %v460_v19 = vadd.f32 %v459_v14, %v129_v48 }
  0xfb   :  { %v163_v15 = vsub.f32 %v149_v24, %v162_v11  ;;  %v164_v17 = vsub.f32 %v152_v50, %v162_v11 }
  0xfc   :  { %v463_v30 = vsel %vm56_vm0, %v460_v19, -inf }
  0xfd   :  { %v165_v27 = vmul.f32 1.442695, %v163_v15  ;;  %v167_v28 = vmul.f32 1.442695, %v164_v17  ;;  %v464_v32 = vmax.f32 %v462_v22, %v463_v30 }
  0xff   :  { %739 = vpow2.f32 %v165_v27  ;;  %v465_v33 = vrot.slane %v464_v32, 4 }
 0x100   :  { %741 = vpow2.f32 %v167_v28  ;;  %v20_v28 = vld [vmem:[%s1231_s2] sm:$0xff] }
 0x101   :  { %v466_v35 = vmax.f32 %v464_v32, %v465_v33 }
 0x103   :  { %v467_v36 = vrot.slane %v466_v35, 2 }
 0x105   :  { %v740_v26 = vpop.eup %739  ;;  %v468_v39 = vmax.f32 %v466_v35, %v467_v36  ;;  %v21_v36 = vld [vmem:[%s1231_s2 + $0x8] sm:$0xff] }
 0x106   :  { %v742_v12 = vpop.eup %741  ;;  %v169_v62 = vsel %vm56_vm0, %v740_v26, 0.0 }
 0x107   :  { %v170_v40 = vsel %vm56_vm0, %v742_v12, 0.0  ;;  %v469_v45 = vrot.slane %v468_v39, 1 }
 0x108   :  { %v171_v54 = vadd.f32 %v170_v40, %v169_v62 }
 0x109   :  { %v470_v38 = vmax.f32 %v468_v39, %v469_v45 }
 0x10a   :  { %v172_v41 = vrot.slane %v171_v54, 4 }
 0x10b   :  { %v471_v16 = vsub.f32 %v457_v8, %v470_v38  ;;  %v472_v7 = vsub.f32 %v460_v19, %v470_v38 }
 0x10c   :  { %v173_v31 = vadd.f32 %v172_v41, %v171_v54 }
 0x10d   :  { %v473_v42 = vmul.f32 1.442695, %v471_v16  ;;  %v475_v18 = vmul.f32 1.442695, %v472_v7 }
 0x10e   :  { %v174_v25 = vrot.slane %v173_v31, 2 }
 0x10f   :  { %743 = vpow2.f32 %v473_v42 }
 0x110   :  { %v175_v59 = vadd.f32 %v174_v25, %v173_v31  ;;  %745 = vpow2.f32 %v475_v18 }
 0x112   :  { %v176_v51 = vrot.slane %v175_v59, 1 }
 0x114   :  { %v177_v13 = vadd.f32 %v176_v51, %v175_v59 }
 0x115   :  { %v744_v44 = vpop.eup %743 }
 0x116   :  { %747 = vrcp.f32 %v177_v13  ;;  %v746_v9 = vpop.eup %745  ;;  %v477_v46 = vsel %vm56_vm0, %v744_v44, 0.0  ;;  %v189_v52 = vand.u32 2147483648, %v177_v13  ;;  %v187_v37 = vand.u32 2147483647, %v177_v13 }
 0x117   :  { %v478_v34 = vsel %vm56_vm0, %v746_v9, 0.0  ;;  %vm183_vm8 = vweird.f32 %v177_v13 }
 0x118   :  { %v479_v4 = vadd.f32 %v478_v34, %v477_v46  ;;  %v190_v20 = vor.u32 1.1754944e-38, %v189_v52  ;;  %vm188_vm10 = vcmp.eq.f32.partialorder %v187_v37, 8.507059e+37 }
 0x11a   :  { %v480_v3 = vrot.slane %v479_v4, 4 }
 0x11c   :  { %v748_v21 = vpop.eup %747  ;;  %v481_v10 = vadd.f32 %v480_v3, %v479_v4 }
 0x11d   :  { %v179_v2 = vmul.f32 %v748_v21, %v177_v13  ;;  %vm184_vm7 = vweird.f32 %v748_v21 }
 0x11e   :  { %v482_v60 = vrot.slane %v481_v10, 2  ;;  %vm185_vm9 = vmor %vm183_vm8, %vm184_vm7 }
 0x11f   :  { %v180_v1 = vsub.f32 1.0, %v179_v2 }
 0x120   :  { %v483_v0 = vadd.f32 %v482_v60, %v481_v10 }
 0x121   :  { %v181_v43 = vmul.f32 %v748_v21, %v180_v1 }
 0x122   :  { %v484_v47 = vrot.slane %v483_v0, 1 }
 0x123   :  { %v182_v29 = vadd.f32 %v748_v21, %v181_v43 }
 0x124   :  { %v485_v23 = vadd.f32 %v484_v47, %v483_v0 }
 0x125   :  { %v186_v24 = vsel %vm185_vm9, %v748_v21, %v182_v29 }
 0x126   :  { %v191_v48 = vsel %vm188_vm10, %v190_v20, %v186_v24  ;;  %749 = vrcp.f32 %v485_v23  ;;  %v497_v58 = vand.u32 2147483648, %v485_v23  ;;  %v495_v5 = vand.u32 2147483647, %v485_v23 }
 0x127   :  { %v193_v49 = vmul.f32 %v740_v26, %v191_v48  ;;  %v194_v55 = vmul.f32 %v742_v12, %v191_v48  ;;  %vm491_vm12 = vweird.f32 %v485_v23 }
 0x128   :  { %v498_v8 = vor.u32 1.1754944e-38, %v497_v58  ;;  %vm496_vm14 = vcmp.eq.f32.partialorder %v495_v5, 8.507059e+37 }
 0x129   :  { %685 = vmatmul.msk.f32.vlgmr.msra.gmra.mxu1 %vm56_vm0, %v193_v49  ;;  %v272_v50 = vsel %vm56_vm0, %v193_v49, 0.0  ;;  %v275_v61 = vsel %vm56_vm0, %v194_v55, 0.0 }
 0x12a   :  { %273 = vadd.xlane.f32.xlu1 %v272_v50 }
 0x12c   :  { %v750_v53 = vpop.eup %749 }
 0x12d   :  { %v487_v56 = vmul.f32 %v750_v53, %v485_v23  ;;  %vm492_vm11 = vweird.f32 %v750_v53 }
 0x12e   :  { %vm493_vm13 = vmor %vm491_vm12, %vm492_vm11 }
 0x12f   :  { %v488_v57 = vsub.f32 1.0, %v487_v56 }
 0x131   :  { %686 = vmatmul.msk.f32.gmra.mxu1 %vm56_vm0, %v194_v55  ;;  %v489_v63 = vmul.f32 %v750_v53, %v488_v57 }
 0x132   :  { %276 = vadd.xlane.f32.xlu1 %v275_v61 }
 0x133   :  { %v490_v6 = vadd.f32 %v750_v53, %v489_v63 }
 0x135   :  { %v494_v11 = vsel %vm493_vm13, %v750_v53, %v490_v6 }
 0x136   :  { %v499_v14 = vsel %vm496_vm14, %v498_v8, %v494_v11 }
 0x137   :  { %v501_v15 = vmul.f32 %v744_v44, %v499_v14  ;;  %v502_v17 = vmul.f32 %v746_v9, %v499_v14 }
 0x139   :  { %719 = vmatmul.msk.f32.vlgmr.msra.gmra.mxu3 %vm56_vm0, %v501_v15  ;;  %v580_v19 = vsel %vm56_vm0, %v501_v15, 0.0  ;;  %v583_v22 = vsel %vm56_vm0, %v502_v17, 0.0 }
 0x13a   :  { %581 = vadd.xlane.f32.xlu0 %v580_v19  ;;  %584 = vadd.xlane.f32.xlu1 %v583_v22 }
 0x141   :  { %720 = vmatmul.msk.f32.gmra.mxu3 %vm56_vm0, %v502_v17 }
 0x19d   :  { %v274_v27 = vpop.xlane.xlu1 %273 }
 0x19e   :  { %v278_v30 = vmul.f32 %v274_v27, %v20_v28 }
 0x1a5   :  { %v277_v26 = vpop.xlane.xlu1 %276 }
 0x1a6   :  { %v266_v32 = vpop.f32.mrf.mxu1  ;;  %v279_v12 = vmul.f32 %v277_v26, %v21_v36 }
 0x1a7   :  { %v280_v33 = vsub.f32 %v266_v32, %v278_v30 }
 0x1a9   :  { %v282_v35 = vmul.f32 %v280_v33, %v280_v33 }
 0x1ab   :  { %284 = vadd.xlane.f32.xlu2 %v282_v35 }
 0x1ad   :  { %v582_v54 = vpop.xlane.xlu0 %581  ;;  %v585_v37 = vpop.xlane.xlu1 %584 }
 0x1ae   :  { %v269_v62 = vpop.f32.mrf.mxu1  ;;  %v586_v45 = vmul.f32 %v582_v54, %v20_v28  ;;  %v587_v20 = vmul.f32 %v585_v37, %v21_v36 }
 0x1af   :  { %v281_v39 = vsub.f32 %v269_v62, %v279_v12 }
 0x1b1   :  { %v283_v40 = vmul.f32 %v281_v39, %v281_v39 }
 0x1b3   :  { %286 = vadd.xlane.f32.xlu2 %v283_v40 }
 0x1bc   :  { %v574_v41 = vpop.f32.mrf.mxu3 }
 0x1bd   :  { %v1209_v38 = vsub.f32 %v574_v41, %v586_v45 }
 0x1bf   :  { %v590_v31 = vmul.f32 %v1209_v38, %v1209_v38 }
 0x1c1   :  { %592 = vadd.xlane.f32.xlu1 %v590_v31 }
 0x1c4   :  { %v577_v29 = vpop.f32.mrf.mxu3 }
 0x1c5   :  { %v589_v23 = vsub.f32 %v577_v29, %v587_v20 }
 0x1c7   :  { %v591_v24 = vmul.f32 %v589_v23, %v589_v23 }
 0x21e   :  { %v285_v16 = vpop.xlane.xlu2 %284 }
 0x21f   :  { %v288_v7 = vmax.f32 %v285_v16, 1e-24 }
 0x221   :  { %751 = vrsqrt.f32 %v288_v7  ;;  %vm296_vm0 = vweird.f32 %v288_v7 }
 0x226   :  { %v287_v42 = vpop.xlane.xlu2 %286 }
 0x227   :  { %v752_v25 = vpop.eup %751  ;;  %v289_v59 = vmax.f32 %v287_v42, 1e-24 }
 0x228   :  { %v291_v18 = vmul.f32 %v752_v25, %v288_v7  ;;  %vm297_vm15 = vweird.f32 %v752_v25 }
 0x229   :  { %753 = vrsqrt.f32 %v289_v59  ;;  %vm298_vm1 = vmor %vm296_vm0, %vm297_vm15  ;;  %vm306_vm3 = vweird.f32 %v289_v59 }
 0x22a   :  { %v292_v51 = vmul.f32 %v752_v25, %v291_v18 }
 0x22c   :  { %v293_v13 = vmul.f32 0.5, %v292_v51 }
 0x22e   :  { %v294_v44 = vsub.f32 1.5, %v293_v13 }
 0x22f   :  { %v754_v9 = vpop.eup %753 }
 0x230   :  { %v301_v46 = vmul.f32 %v754_v9, %v289_v59  ;;  %v295_v34 = vmul.f32 %v752_v25, %v294_v44  ;;  %vm307_vm2 = vweird.f32 %v754_v9 }
 0x231   :  { %vm308_vm4 = vmor %vm306_vm3, %vm307_vm2 }
 0x232   :  { %v302_v4 = vmul.f32 %v754_v9, %v301_v46  ;;  %v299_v10 = vsel %vm298_vm1, %v752_v25, %v295_v34 }
 0x233   :  { %v1213_v60 = vmul.f32 %v299_v10, %v280_v33 }
 0x234   :  { %v303_v3 = vmul.f32 0.5, %v302_v4  ;;  %v593_v48 = vpop.xlane.xlu1 %592 }
 0x235   :  { %v312_v0 = vmul.f32 %v1213_v60, %v1213_v60  ;;  %v596_v49 = vmax.f32 %v593_v48, 1e-24 }
 0x236   :  { %v304_v21 = vsub.f32 1.5, %v303_v3 }
 0x237   :  { %755 = vrsqrt.f32 %v596_v49  ;;  %vm604_vm6 = vweird.f32 %v596_v49 }
 0x238   :  { %v305_v2 = vmul.f32 %v754_v9, %v304_v21 }
 0x23a   :  { %v309_v1 = vsel %vm308_vm4, %v754_v9, %v305_v2 }
 0x23b   :  { %v1215_v52 = vmul.f32 %v309_v1, %v281_v39 }
 0x23d   :  { %v313_v43 = vmul.f32 %v1215_v52, %v1215_v52  ;;  %v756_v53 = vpop.eup %755 }
 0x23e   :  { %v599_v57 = vmul.f32 %v756_v53, %v596_v49  ;;  %vm605_vm5 = vweird.f32 %v756_v53 }
 0x23f   :  { %v314_v47 = vadd.f32 %v313_v43, %v312_v0  ;;  %vm606_vm7 = vmor %vm604_vm6, %vm605_vm5 }
 0x240   :  { %v600_v63 = vmul.f32 %v756_v53, %v599_v57 }
 0x241   :  { %315 = vadd.xlane.f32.xlu2 %v314_v47 }
 0x242   :  { %v601_v14 = vmul.f32 0.5, %v600_v63 }
 0x244   :  { %v602_v15 = vsub.f32 1.5, %v601_v14 }
 0x246   :  { %v603_v22 = vmul.f32 %v756_v53, %v602_v15 }
 0x248   :  { %v607_v32 = vsel %vm606_vm7, %v756_v53, %v603_v22 }
 0x249   :  { %594 = vadd.xlane.f32.xlu2 %v591_v24  ;;  %v618_v35 = vmul.f32 %v607_v32, %v1209_v38 }
 0x24b   :  { %v620_v12 = vmul.f32 %v618_v35, %v618_v35 }
 0x2b4   :  { %v316_v50 = vpop.xlane.xlu2 %315 }
 0x2b5   :  { %v317_v55 = vrot.slane %v316_v50, 4 }
 0x2b7   :  { %v318_v56 = vadd.f32 %v317_v55, %v316_v50 }
 0x2b9   :  { %v319_v58 = vrot.slane %v318_v56, 2 }
 0x2bb   :  { %v320_v61 = vadd.f32 %v319_v58, %v318_v56 }
 0x2bc   :  { %v595_v5 = vpop.xlane.xlu2 %594 }
 0x2bd   :  { %v597_v6 = vmax.f32 %v595_v5, 1e-24  ;;  %v321_v8 = vrot.slane %v320_v61, 1 }
 0x2bf   :  { %757 = vrsqrt.f32 %v597_v6  ;;  %v322_v11 = vadd.f32 %v321_v8, %v320_v61  ;;  %vm614_vm9 = vweird.f32 %v597_v6 }
 0x2c1   :  { %721 = vpush %v322_v11 }
 0x2c5   :  { %v758_v17 = vpop.eup %757 }
 0x2c6   :  { %v609_v19 = vmul.f32 %v758_v17, %v597_v6  ;;  %vm615_vm8 = vweird.f32 %v758_v17 }
 0x2c7   :  { %vm616_vm10 = vmor %vm614_vm9, %vm615_vm8 }
 0x2c8   :  { %v610_v27 = vmul.f32 %v758_v17, %v609_v19 }
 0x2ca   :  { %v611_v28 = vmul.f32 0.5, %v610_v27 }
 0x2cc   :  { %v612_v30 = vsub.f32 1.5, %v611_v28 }
 0x2ce   :  { %v613_v33 = vmul.f32 %v758_v17, %v612_v30 }
 0x2d0   :  { %v617_v36 = vsel %vm616_vm10, %v758_v17, %v613_v33 }
 0x2d1   :  { %v619_v26 = vmul.f32 %v617_v36, %v589_v23 }
 0x2d3   :  { %v621_v62 = vmul.f32 %v619_v26, %v619_v26 }
 0x2d5   :  { %v622_v39 = vadd.f32 %v621_v62, %v620_v12 }
 0x2d7   :  { %623 = vadd.xlane.f32.xlu1 %v622_v39 }
 0x2f2   :  { %s722_s2 = spop %721 }
 0x2f3   :  { %s324_s11 = smax.f32 %s790_s10, %s722_s2 }
 0x2f4   :  { %v325_v40 = vstv %s324_s11 }
 0x2f5   :  { %759 = vrsqrt.f32 %v325_v40  ;;  %vm332_vm12 = vweird.f32 %v325_v40 }
 0x2fb   :  { %v760_v54 = vpop.eup %759 }
 0x2fc   :  { %v327_v45 = vmul.f32 %v760_v54, %v325_v40  ;;  %vm333_vm11 = vweird.f32 %v760_v54 }
 0x2fd   :  { %vm334_vm13 = vmor %vm332_vm12, %vm333_vm11 }
 0x2fe   :  { %v328_v41 = vmul.f32 %v760_v54, %v327_v45 }
 0x300   :  { %v329_v31 = vmul.f32 0.5, %v328_v41 }
 0x302   :  { %v330_v16 = vsub.f32 1.5, %v329_v31 }
 0x304   :  { %v331_v38 = vmul.f32 %v760_v54, %v330_v16 }
 0x306   :  { %v335_v7 = vsel %vm334_vm13, %v760_v54, %v331_v38 }
 0x307   :  { %723 = vpush %v335_v7 }
 0x338   :  { %s724_s12 = spop %723 }
 0x339   :  { %v337_v25 = vstv %s724_s12 }
 0x33a   :  { %v338_v42 = vmul.f32 %v337_v25, %v1213_v60  ;;  %v339_v18 = vmul.f32 %v337_v25, %v1215_v52 }
 0x33c   :  { %340 = vst [vmem:[#allocation2] sm:$0xff] %v338_v42 }
 0x33d   :  { %341 = vst [vmem:[#allocation2 + $0x8] sm:$0xff] %v339_v18 }
 0x34a   :  { %v624_v59 = vpop.xlane.xlu1 %623 }
 0x34b   :  { %v625_v51 = vrot.slane %v624_v59, 4 }
 0x34d   :  { %v626_v13 = vadd.f32 %v625_v51, %v624_v59 }
 0x34f   :  { %v627_v44 = vrot.slane %v626_v13, 2 }
 0x351   :  { %v628_v9 = vadd.f32 %v627_v44, %v626_v13 }
 0x353   :  { %v629_v46 = vrot.slane %v628_v9, 1 }
 0x355   :  { %v630_v34 = vadd.f32 %v629_v46, %v628_v9 }
 0x357   :  { %725 = vpush %v630_v34 }
 0x388   :  { %s726_s13 = spop %725 }
 0x389   :  { %s632_s14 = smax.f32 %s790_s10, %s726_s13 }
 0x38a   :  { %v633_v4 = vstv %s632_s14 }
 0x38b   :  { %761 = vrsqrt.f32 %v633_v4  ;;  %vm640_vm15 = vweird.f32 %v633_v4 }
 0x391   :  { %v762_v3 = vpop.eup %761 }
 0x392   :  { %v635_v21 = vmul.f32 %v762_v3, %v633_v4  ;;  %vm641_vm14 = vweird.f32 %v762_v3 }
 0x393   :  { %vm642_vm0 = vmor %vm640_vm15, %vm641_vm14 }
 0x394   :  { %v636_v10 = vmul.f32 %v762_v3, %v635_v21 }
 0x396   :  { %v637_v2 = vmul.f32 0.5, %v636_v10 }
 0x398   :  { %v638_v60 = vsub.f32 1.5, %v637_v2 }
 0x39a   :  { %v639_v1 = vmul.f32 %v762_v3, %v638_v60 }
 0x39c   :  { %v643_v52 = vsel %vm642_vm0, %v762_v3, %v639_v1 }
 0x39d   :  { %727 = vpush %v643_v52 }
 0x3ce   :  { %s728_s20 = spop %727 }
 0x3cf   :  { %v645_v0 = vstv %s728_s20 }
 0x3d0   :  { %v646_v43 = vmul.f32 %v645_v0, %v618_v35  ;;  %v647_v37 = vmul.f32 %v645_v0, %v619_v26 }
 0x3d2   :  { %649 = vst [vmem:[#allocation2 + $0x10] sm:$0xff] %v646_v43 }
 0x3d3   :  { %650 = vst [vmem:[#allocation2 + $0x18] sm:$0xff] %v647_v37 }
 0x3d4   :  { %663 = dma.vmem_to_hbm [thread:$0]  %s656_s16, 512, %s658_s19, [#allocation3], %s792_s21, %s792_s21, %s793_s22  }
 0x3d5   :  { %787 = dma.done.wait [#allocation3], 512  }
 0x3d6   :  { %788 = vsyncadd [#allocation3], 4294966784 }
 0x3d7   :  { %668 = vsyncpa [#allocation3], 1 }

</bundles_post_ra>
